<compile_context>
chip_gen: v7x
topology: tpu7x:2x2x1
jax: 0.10.0
libtpu: 0.0.40
codegen_flags: <defaults>
</compile_context>

<pallas_src>
import functools

import jax
import jax.numpy as jnp
from jax.experimental import pallas as pl
from jax.experimental.pallas import tpu as pltpu


def _round_up(x, m):
    return ((x + m - 1) // m) * m


def _action_head_kernel(head_slices, activation, x_ref, w_ref, b_ref, out_ref):
    """head_slices: tuple of (offset, size) per head inside the fused class dim."""
    # Single MXU matmul; K = T*D already carries the 1/T-scaled mean over T.
    logits = jnp.dot(x_ref[...], w_ref[...],
                     preferred_element_type=jnp.float32) + b_ref[...]   # (tn, P) f32

    if activation == "softmax":
        pieces = []
        for off, n in head_slices:                 # static slices: never touch the pad
            l = logits[:, off:off + n]
            m = jnp.max(l, axis=-1, keepdims=True)
            e = jnp.exp(l - m)
            s = jnp.sum(e, axis=-1, keepdims=True)
            pieces.append(e / s)                   # exact division: rows sum to 1
        total = head_slices[-1][0] + head_slices[-1][1]
        pad = out_ref.shape[-1] - total
        if pad:
            pieces.append(jnp.zeros((logits.shape[0], pad), jnp.float32))
        out = jnp.concatenate(pieces, axis=-1)     # (tn, P) lane-dense
    elif activation == "sigmoid":
        out = jax.nn.sigmoid(logits)               # pad lanes sliced away in wrapper
    else:
        out = logits                               # pad lanes are exactly 0
    out_ref[...] = out.astype(out_ref.dtype)


def _pick_batch_tile(N, bytes_per_row, *, vmem_budget_bytes=16 << 20,
                     num_buffers=2, min_steps=1):
    """Largest batch tile (rows, multiple of 8) whose pipelined working set fits
    the budget.  Grid is cdiv(N, tn); the last block may be partial."""
    rows = vmem_budget_bytes // max(1, num_buffers * bytes_per_row)
    rows = max(8, (rows // 8) * 8)
    if min_steps > 1:
        cap = max(8, _round_up(-(-N // min_steps), 8))   # >= min_steps grid steps
        rows = min(rows, cap)
    if rows >= N:
        return N        # whole batch in one block (full-dim block is always legal)
    return rows


def action_head_forward(x, weights, biases, *, training=False, test_noact=False,
                        act_func="softmax"):
    """x: (N, T, D); weights[h]: (D, n_h) (== PyTorch weight.T); biases[h]: (n_h,).

    Returns a list of (N, n_h) f32 arrays, one per head (matching ActionHead.forward).
    """
    num_heads = len(weights)
    assert num_heads == len(biases) and num_heads > 0
    apply_act = (not training) and (not test_noact)
    activation = act_func if apply_act else "none"
    # TODO(synk): dropout_rate == 0.0 in this config, so nn.Dropout is never created.

    N, T, D = x.shape
    K = T * D
    sizes = [int(w.shape[1]) for w in weights]
    head_slices, off = [], 0
    for n in sizes:
        head_slices.append((off, n))
        off += n
    total = off
    P = _round_up(total, 128)                       # lane-dense output width

    # Fused weight: concat heads -> (D, total), fold in 1/T, zero-pad to (D, P),
    # tile over T -> (K, P) so the T-mean happens inside the single matmul.
    w_cat = jnp.concatenate(weights, axis=1).astype(jnp.float32) * (1.0 / float(T))
    b_cat = jnp.concatenate([b.reshape(-1).astype(jnp.float32) for b in biases])
    pad = P - total
    if pad:
        w_cat = jnp.pad(w_cat, ((0, 0), (0, pad)))
        b_cat = jnp.pad(b_cat, ((0, pad),))
    w_full = jnp.tile(w_cat, (T, 1))                # (K, P)
    if x.dtype == jnp.bfloat16:
        w_full = w_full.astype(jnp.bfloat16)        # bf16 x bf16 -> f32 on the MXU
    b_cat = b_cat.reshape(1, P)

    x2 = x.reshape(N, K)                            # free row-major view, lane-dense

    # Padding-aware per-row VMEM cost (x block row + f32 out block row), each
    # double-buffered by the pipeline.  Budget stays far below default scoped VMEM.
    bytes_per_row = _round_up(K, 128) * x2.dtype.itemsize + P * 4
    tn = _pick_batch_tile(N, bytes_per_row,
                          vmem_budget_bytes=16 << 20, num_buffers=2,
                          min_steps=2 if N >= 256 else 1)
    grid = (pl.cdiv(N, tn),)

    kernel = functools.partial(_action_head_kernel, tuple(head_slices), activation)

    fused = pl.pallas_call(
        kernel,
        grid=grid,
        in_specs=[
            pl.BlockSpec((tn, K), lambda i: (i, 0)),      # streamed over batch
            pl.BlockSpec((K, P), lambda i: (0, 0)),       # resident weight
            pl.BlockSpec((1, P), lambda i: (0, 0)),       # resident bias
        ],
        out_specs=pl.BlockSpec((tn, P), lambda i: (i, 0)),
        out_shape=jax.ShapeDtypeStruct((N, P), jnp.float32),  # probs always f32
        compiler_params=pltpu.CompilerParams(
            dimension_semantics=("parallel",),            # shard batch tiles on v7x
        ),
    )(x2, w_full, b_cat)

    # Split the fused, lane-dense output back into per-head tensors (cheap slices).
    return [fused[:, o:o + n] for (o, n) in head_slices]


if __name__ == "__main__":
    key = jax.random.PRNGKey(0)

    # ActionHead(dim_in=[16, 16], num_classes=[8, 6], act_func='softmax'), eval mode.
    dim_in = [16, 16]
    D = sum(dim_in)                 # 32
    num_classes = [8, 6]
    N, T = 2, 8                     # batch=2, seq=8

    keys = jax.random.split(key, 1 + len(num_classes))
    x = jax.random.normal(keys[0], (N, T, D), dtype=jnp.float32)

    weights, biases = [], []
    bound = float(D) ** -0.5
    for i, n in enumerate(num_classes):
        kw, kb = jax.random.split(keys[1 + i], 2)
        # Deterministic init mimicking nn.Linear's U(-1/sqrt(fan_in), 1/sqrt(fan_in)),
        # stored transposed as (D, n) so the kernel does feat @ W.
        weights.append(jax.random.uniform(kw, (D, n), jnp.float32, -bound, bound))
        biases.append(jax.random.uniform(kb, (n,), jnp.float32, -bound, bound))

    outs = action_head_forward(x, weights, biases, training=False, test_noact=False)
    outs = jax.block_until_ready(outs)

    # Pure-JAX reference (eval mode, softmax over classes).
    feat = x.mean(axis=1)
    refs = [jax.nn.softmax(feat @ w + b, axis=-1) for w, b in zip(weights, biases)]
    for o, r in zip(outs, refs):
        assert o.shape == r.shape and o.dtype == r.dtype
        assert jnp.allclose(o, r, atol=2e-3, rtol=2e-3)
        # Exact softmax division -> rows sum to 1 to float rounding.
        assert jnp.allclose(jnp.sum(o, axis=-1), 1.0, atol=1e-3)

    print("KERNEL_OK")
</pallas_src>

<mosaic_0001>
module attributes {stable_mosaic.version = 11 : i64} {
  func.func @_action_head_kernel(%arg0: i32, %arg1: memref<2x256xf32, #tpu.memory_space<vmem>>, %arg2: memref<256x128xf32, #tpu.memory_space<vmem>>, %arg3: memref<1x128xf32, #tpu.memory_space<vmem>>, %arg4: memref<2x128xf32, #tpu.memory_space<vmem>>) attributes {dimension_semantics = [#tpu.dimension_semantics<parallel>], iteration_bounds = array<i64: 1>, scalar_prefetch = 0 : i64, scratch_operands = 0 : i64, tpu.core_type = #tpu.core_type<tc>, window_params = [{transform_indices = @transform_0, window_bounds = array<i64: 2, 256>}, {pipeline_mode = #tpu.pipeline_mode<synchronous>, transform_indices = @transform_1, window_bounds = array<i64: 256, 128>}, {pipeline_mode = #tpu.pipeline_mode<synchronous>, transform_indices = @transform_2, window_bounds = array<i64: 1, 128>}, {transform_indices = @transform_3, window_bounds = array<i64: 2, 128>}]} {
    %c0 = arith.constant 0 : index
    %c0_0 = arith.constant 0 : index
    %0 = vector.load %arg1[%c0, %c0_0] : memref<2x256xf32, #tpu.memory_space<vmem>>, vector<2x256xf32>
    %c0_1 = arith.constant 0 : index
    %c0_2 = arith.constant 0 : index
    %1 = vector.load %arg2[%c0_1, %c0_2] : memref<256x128xf32, #tpu.memory_space<vmem>>, vector<256x128xf32>
    %cst = arith.constant dense<0.000000e+00> : vector<2x128xf32>
    %2 = tpu.matmul %0, %1, %cst {dimension_numbers = #tpu.dot_dimension_numbers<[1], [0], [0], [1], [0, 0, 1, 1], [], []>} : vector<2x256xf32>, vector<256x128xf32>, vector<2x128xf32> -> vector<2x128xf32>
    %c0_3 = arith.constant 0 : index
    %c0_4 = arith.constant 0 : index
    %3 = vector.load %arg3[%c0_3, %c0_4] : memref<1x128xf32, #tpu.memory_space<vmem>>, vector<1x128xf32>
    %4 = vector.broadcast %3 : vector<1x128xf32> to vector<2x128xf32>
    %5 = arith.addf %2, %4 : vector<2x128xf32>
    %6 = vector.extract_strided_slice %5 {offsets = [0, 0], sizes = [2, 8], strides = [1, 1]} : vector<2x128xf32> to vector<2x8xf32>
    %cst_5 = arith.constant dense<0xFF800000> : vector<2xf32>
    %7 = vector.multi_reduction <maximumf>, %6, %cst_5 [1] : vector<2x8xf32> to vector<2xf32>
    %8 = vector.shape_cast %7 : vector<2xf32> to vector<2x1xf32>
    %9 = vector.broadcast %8 : vector<2x1xf32> to vector<2x8xf32>
    %10 = arith.subf %6, %9 : vector<2x8xf32>
    %11 = math.exp %10 : vector<2x8xf32>
    %cst_6 = arith.constant dense<0.000000e+00> : vector<2xf32>
    %12 = vector.multi_reduction <add>, %11, %cst_6 [1] : vector<2x8xf32> to vector<2xf32>
    %13 = vector.shape_cast %12 : vector<2xf32> to vector<2x1xf32>
    %14 = vector.broadcast %13 : vector<2x1xf32> to vector<2x8xf32>
    %15 = arith.divf %11, %14 : vector<2x8xf32>
    %16 = vector.extract_strided_slice %5 {offsets = [0, 8], sizes = [2, 6], strides = [1, 1]} : vector<2x128xf32> to vector<2x6xf32>
    %cst_7 = arith.constant dense<0xFF800000> : vector<2xf32>
    %17 = vector.multi_reduction <maximumf>, %16, %cst_7 [1] : vector<2x6xf32> to vector<2xf32>
    %18 = vector.shape_cast %17 : vector<2xf32> to vector<2x1xf32>
    %19 = vector.broadcast %18 : vector<2x1xf32> to vector<2x6xf32>
    %20 = arith.subf %16, %19 : vector<2x6xf32>
    %21 = math.exp %20 : vector<2x6xf32>
    %cst_8 = arith.constant dense<0.000000e+00> : vector<2xf32>
    %22 = vector.multi_reduction <add>, %21, %cst_8 [1] : vector<2x6xf32> to vector<2xf32>
    %23 = vector.shape_cast %22 : vector<2xf32> to vector<2x1xf32>
    %24 = vector.broadcast %23 : vector<2x1xf32> to vector<2x6xf32>
    %25 = arith.divf %21, %24 : vector<2x6xf32>
    %cst_9 = arith.constant 0.000000e+00 : f32
    %26 = vector.broadcast %cst_9 : f32 to vector<2x114xf32>
    %27 = tpu.concatenate %15, %25, %26 in 1 : vector<2x8xf32>, vector<2x6xf32>, vector<2x114xf32> -> vector<2x128xf32>
    %c0_10 = arith.constant 0 : index
    %c0_11 = arith.constant 0 : index
    %28 = vector.load %arg4[%c0_10, %c0_11] : memref<2x128xf32, #tpu.memory_space<vmem>>, vector<2x128xf32>
    tpu.vector_store %arg4[%c0_10, %c0_11], %27 {strides = array<i32>} : memref<2x128xf32, #tpu.memory_space<vmem>>, vector<2x128xf32>,
    return
  }
  func.func @transform_0(%arg0: i32) -> (i32, i32) {
    %c0_i32 = arith.constant 0 : i32
    %c0_i32_0 = arith.constant 0 : i32
    return %arg0, %c0_i32 : i32, i32
  }
  func.func @transform_1(%arg0: i32) -> (i32, i32) {
    %c0_i32 = arith.constant 0 : i32
    %c0_i32_0 = arith.constant 0 : i32
    %c0_i32_1 = arith.constant 0 : i32
    return %c0_i32, %c0_i32_0 : i32, i32
  }
  func.func @transform_2(%arg0: i32) -> (i32, i32) {
    %c0_i32 = arith.constant 0 : i32
    %c0_i32_0 = arith.constant 0 : i32
    %c0_i32_1 = arith.constant 0 : i32
    return %c0_i32, %c0_i32_0 : i32, i32
  }
  func.func @transform_3(%arg0: i32) -> (i32, i32) {
    %c0_i32 = arith.constant 0 : i32
    %c0_i32_0 = arith.constant 0 : i32
    return %arg0, %c0_i32 : i32, i32
  }
}

</mosaic_0001>

<bundles_post_ra>
// kernel: tpu_custom_call.1
= control target key start
LH: loop header
LB: loop body
LE: loop exit
PB: predicated region body
PF: predicated region fallthrough
CT: control target
= control target key end

     0   :  { %8 = vsyncpa [#allocation3], 0  ;;  %s439_s0 = inlined_call_operand.hbm [shape: f32[2,256], index: 0, kind: input, shape index: {}]   ;;  %s440_s1 = inlined_call_operand.hbm [shape: f32[256,128], index: 1, kind: input, shape index: {}]   ;;  %s441_s2 = inlined_call_operand.vmem [shape: f32[1,128], index: 2, kind: input, shape index: {}]   ;;  %s442_s3 = inlined_call_operand.hbm [shape: f32[2,128], index: 3, kind: output, shape index: {}]  }
   0x1   :  { %9 = vsyncpa [#allocation6], 0 }
   0x2   :  { %10 = vsyncpa [#allocation4], 0  ;;  %s367_s12 = smov [#allocation2]   ;;  %s368_s14 = smov [#allocation5]  }
   0x3   :  { %s17_s13 = sshll.u32 %s367_s12, 4  ;;  %s26_s15 = sshll.u32 %s368_s14, 4  ;;  %s18_s13 = int_to_ptr.vmem [resolvable:$true] %s17_s13  ;;  %s393_s15 = int_to_ptr.vmem [resolvable:$true] %s26_s15 }
   0x4   :  { %s295_s18 = scalar_lea.hbm %s439_s0, 64 }
   0x5   :  { %p296_p0 = scmp.ne.s32.totalorder %s439_s0, %s295_s18  ;;  %p299_p1 = scmp.lt.u32.totalorder %s295_s18, %s439_s0 }
   0x7   :  { %p301_p2 = pnand %p299_p1, %p296_p0 }
   0x9   :  { %304 = shalt.err (!%p301_p2)
}
   0xa   :  { %s305_s23 = scalar_lea.vmem %s18_s13, 64  ;;  %p310_p4 = scmp.lt.s32.totalorder %s18_s13, %s18_s13 }
   0xb   :  { %p306_p3 = scmp.ne.s32.totalorder %s18_s13, %s305_s23  ;;  %p311_p5 = scmp.lt.s32.totalorder %s305_s23, %s305_s23 }
   0xd   :  { %p312_p6 = por %p311_p5, %p310_p4 }
   0xf   :  { %p313_p7 = pnand %p312_p6, %p306_p3 }
  0x11   :  { %316 = shalt.err (!%p313_p7)
}
  0x12   :  { %20 = dma.hbm_to_vmem [thread:$0]  %s439_s0, 64, %s18_s13, [#allocation3]  }
  0x13   :  { %s317_s28 = scalar_lea.hbm %s440_s1, 4096 }
  0x14   :  { %p318_p8 = scmp.ne.s32.totalorder %s440_s1, %s317_s28  ;;  %p321_p9 = scmp.lt.u32.totalorder %s317_s28, %s440_s1 }
  0x16   :  { %p323_p10 = pnand %p321_p9, %p318_p8 }
  0x18   :  { %326 = shalt.err (!%p323_p10)
}
  0x19   :  { %s327_s6 = scalar_lea.vmem %s393_s15, 4096  ;;  %p332_p12 = scmp.lt.s32.totalorder %s393_s15, %s393_s15 }
  0x1a   :  { %p328_p11 = scmp.ne.s32.totalorder %s393_s15, %s327_s6  ;;  %p333_p13 = scmp.lt.s32.totalorder %s327_s6, %s327_s6 }
  0x1c   :  { %p334_p0 = por %p333_p13, %p332_p12 }
  0x1e   :  { %p335_p1 = pnand %p334_p0, %p328_p11 }
  0x20   :  { %338 = shalt.err (!%p335_p1)
}
  0x21   :  { %s369_s0 = smov 128   ;;  %s370_s7 = smov 8  }
  0x22   :  { %32 = dma.hbm_to_vmem [thread:$0]  %s440_s1, 4096, %s393_s15, [#allocation6], %s369_s0, %s369_s0, %s370_s7  }
  0x23   :  { %361 = dma.done.wait [#allocation3], 64  }
  0x24   :  { %362 = vsyncadd [#allocation3], 4294967232 }
  0x25   :  { %363 = dma.done.wait [#allocation6], 4096  }
  0x26   :  { %364 = vsyncadd [#allocation6], 4294963200  ;;  %v58_v0 = vld [vmem:[#allocation5 + $0x80] sm:$0xff]  ;;  %v59_v1 = vld [vmem:[#allocation5 + $0x88] sm:$0xff]  ;;  %vm174_vm0 = vcmask 107584   ;;  %vm162_vm1 = vcmask 58368  }
  0x27   :  { %v42_v2 = vld [vmem:[#allocation5] sm:$0xff]  ;;  %v249_v3 = vpack.c.bf16 %v59_v1, %v58_v0  ;;  %v43_v4 = vld [vmem:[#allocation5 + $0x8] sm:$0xff]  ;;  %v60_v5 = vld [vmem:[#allocation5 + $0x90] sm:$0xff]  ;;  %s371_s11 = smov 120   ;;  %vm185_vm2 = vcmask 41984   ;;  %vm191_vm3 = vcmask 64512  }
  0x28   :  { %v61_v6 = vld [vmem:[#allocation5 + $0x98] sm:$0xff]  ;;  %v251_v7 = vpack.c.bf16 %v43_v4, %v42_v2  ;;  %v44_v9 = vld [vmem:[#allocation5 + $0x10] sm:$0xff]  ;;  %v62_v11 = vld [vmem:[#allocation5 + $0xa0] sm:$0xff]  ;;  %vm193_vm4 = vcmask 113664  }
  0x29   :  { %v253_v8 = vpack.c.bf16 %v61_v6, %v60_v5  ;;  %v45_v10 = vld [vmem:[#allocation5 + $0x18] sm:$0xff]  ;;  %250 = vmatprep.subr.bf16.mxu0 %v249_v3  ;;  %v63_v12 = vld [vmem:[#allocation5 + $0xa8] sm:$0xff]  ;;  %v46_v15 = vld [vmem:[#allocation5 + $0x20] sm:$0xff] }
  0x2a   :  { %252 = vmatpush3.bf16.msra.mxu0 %v251_v7  ;;  %v255_v13 = vpack.c.bf16 %v45_v10, %v44_v9  ;;  %v257_v14 = vpack.c.bf16 %v63_v12, %v62_v11  ;;  %v47_v16 = vld [vmem:[#allocation5 + $0x28] sm:$0xff]  ;;  %v64_v17 = vld [vmem:[#allocation5 + $0xb0] sm:$0xff]  ;;  %v65_v18 = vld [vmem:[#allocation5 + $0xb8] sm:$0xff] }
  0x2b   :  { %254 = vmatprep.subr.bf16.mxu0 %v253_v8  ;;  %v259_v19 = vpack.c.bf16 %v47_v16, %v46_v15  ;;  %v261_v20 = vpack.c.bf16 %v65_v18, %v64_v17  ;;  %v48_v21 = vld [vmem:[#allocation5 + $0x30] sm:$0xff]  ;;  %v49_v22 = vld [vmem:[#allocation5 + $0x38] sm:$0xff]  ;;  %v66_v23 = vld [vmem:[#allocation5 + $0xc0] sm:$0xff] }
  0x2c   :  { %v67_v24 = vld [vmem:[#allocation5 + $0xc8] sm:$0xff]  ;;  %v213_v25 = vld.sshfl [vmem:[#allocation2] sm:$0x33 pattern:$0x76325410]  ;;  %v263_v27 = vpack.c.bf16 %v49_v22, %v48_v21  ;;  %v50_v29 = vld [vmem:[#allocation5 + $0x40] sm:$0xff] }
  0x2d   :  { %v89_v26 = vcombine.high %v213_v25, %v213_v25  ;;  %v265_v28 = vpack.c.bf16 %v67_v24, %v66_v23  ;;  %v51_v30 = vld [vmem:[#allocation5 + $0x48] sm:$0xff]  ;;  %v68_v31 = vld [vmem:[#allocation5 + $0xd0] sm:$0xff]  ;;  %v69_v32 = vld [vmem:[#allocation5 + $0xd8] sm:$0xff] }
  0x2e   :  { %256 = vmatpush3.bf16.msra.mxu0 %v255_v13  ;;  %v267_v33 = vpack.c.bf16 %v51_v30, %v50_v29  ;;  %v269_v34 = vpack.c.bf16 %v69_v32, %v68_v31  ;;  %v52_v35 = vld [vmem:[#allocation5 + $0x50] sm:$0xff]  ;;  %v53_v36 = vld [vmem:[#allocation5 + $0x58] sm:$0xff]  ;;  %v70_v37 = vld [vmem:[#allocation5 + $0xe0] sm:$0xff] }
  0x2f   :  { %258 = vmatprep.subr.bf16.mxu0 %v257_v14  ;;  %156 = vmatprep.mubr.f32.mxu0 %v89_v26  ;;  %v71_v38 = vld [vmem:[#allocation5 + $0xe8] sm:$0xff]  ;;  %v271_v39 = vpack.c.bf16 %v53_v36, %v52_v35  ;;  %v54_v41 = vld [vmem:[#allocation5 + $0x60] sm:$0xff]  ;;  %v72_v43 = vld [vmem:[#allocation5 + $0xf0] sm:$0xff] }
  0x30   :  { %v273_v40 = vpack.c.bf16 %v71_v38, %v70_v37  ;;  %v55_v42 = vld [vmem:[#allocation5 + $0x68] sm:$0xff]  ;;  %v73_v44 = vld [vmem:[#allocation5 + $0xf8] sm:$0xff]  ;;  %v56_v47 = vld [vmem:[#allocation5 + $0x70] sm:$0xff] }
  0x31   :  { %v275_v45 = vpack.c.bf16 %v55_v42, %v54_v41  ;;  %v277_v46 = vpack.c.bf16 %v73_v44, %v72_v43  ;;  %v57_v48 = vld [vmem:[#allocation5 + $0x78] sm:$0xff] }
  0x32   :  { %260 = vmatpush3.bf16.msra.mxu0 %v259_v19  ;;  %v279_v49 = vpack.c.bf16 %v57_v48, %v56_v47  ;;  %v212_v51 = vld [vmem:[%s441_s2] ss:$0 sm:$0xff]  ;;  %s372_s2 = smov [#allocation7]  }
  0x33   :  { %262 = vmatprep.subr.bf16.mxu0 %v261_v20  ;;  %s202_s12 = sshll.u32 %s372_s2, 4  ;;  %s203_s12 = int_to_ptr.vmem [resolvable:$true] %s202_s12 }
  0x34   :  { %s339_s13 = scalar_lea.vmem %s203_s12, 32  ;;  %p344_p3 = scmp.lt.s32.totalorder %s203_s12, %s203_s12 }
  0x35   :  { %p340_p2 = scmp.ne.s32.totalorder %s203_s12, %s339_s13  ;;  %p345_p4 = scmp.lt.s32.totalorder %s339_s13, %s339_s13 }
  0x36   :  { %264 = vmatpush3.bf16.msra.mxu0 %v263_v27 }
  0x37   :  { %266 = vmatprep.subr.bf16.mxu0 %v265_v28  ;;  %p346_p5 = por %p345_p4, %p344_p3 }
  0x39   :  { %p347_p6 = pnand %p346_p5, %p340_p2 }
  0x3a   :  { %268 = vmatpush3.bf16.msra.mxu0 %v267_v33 }
  0x3b   :  { %270 = vmatprep.subr.bf16.mxu0 %v269_v34 }
  0x3e   :  { %272 = vmatpush3.bf16.msra.mxu0 %v271_v39 }
  0x3f   :  { %274 = vmatprep.subr.bf16.mxu0 %v273_v40 }
  0x42   :  { %276 = vmatpush3.bf16.msra.mxu0 %v275_v45 }
  0x43   :  { %278 = vmatprep.subr.bf16.mxu0 %v277_v46 }
  0x46   :  { %280 = vmatpush3.bf16.msra.mxu0 %v279_v49 }
  0x49   :  { %157 = vmatmul.mubr.f32.vlgmr.msra.gmra.mrb[0].mxu0 %v213_v25 }
 0x11c   :  { %v246_v50 = vpop.f32.mrb[0].mxu0 }
 0x11d   :  { %v247_v52 = vpop.f32.mrb[1].mxu0 }
 0x11e   :  { %v248_v53 = vadd.f32 %v247_v52, %v246_v50 }
 0x120   :  { %v159_v54 = vadd.f32 %v248_v53, %v212_v51 }
 0x122   :  { %v175_v55 = vsel %vm174_vm0, %v159_v54, -inf  ;;  %v163_v56 = vsel %vm162_vm1, %v159_v54, -inf }
 0x123   :  { %176 = vmax.xlane.f32.xlu0 %v175_v55 }
 0x127   :  { %164 = vmax.xlane.f32.xlu0 %v163_v56 }
 0x1b0   :  { %v177_v57 = vpop.xlane.xlu0 %176 }
 0x1b1   :  { %v178_v58 = vsub.f32 %v159_v54, %v177_v57 }
 0x1b3   :  { %v179_v59 = vmul.f32 1.442695, %v178_v58 }
 0x1b4   :  { %v165_v61 = vpop.xlane.xlu0 %164 }
 0x1b5   :  { %287 = vpow2.f32 %v179_v59  ;;  %v166_v62 = vsub.f32 %v159_v54, %v165_v61 }
 0x1b7   :  { %v167_v63 = vmul.f32 1.442695, %v166_v62 }
 0x1b9   :  { %289 = vpow2.f32 %v167_v63 }
 0x1bf   :  { %v288_v60 = vpop.eup %287 }
 0x1c0   :  { %182 = vrot.lane.b32.xlu1 %v288_v60, %s371_s11 }
 0x1c3   :  { %v290_v0 = vpop.eup %289 }
 0x1c4   :  { %v169_v1 = vsel %vm162_vm1, %v290_v0, 0.0 }
 0x1e4   :  { %170 = vadd.xlane.f32.xlu1 %v169_v1 }
 0x232   :  { %v183_v2 = vpop.permute.xlu1 %182 }
 0x233   :  { %v186_v3 = vsel %vm185_vm2, %v183_v2, 0.0 }
 0x234   :  { %187 = vadd.xlane.f32.xlu0 %v186_v3 }
 0x271   :  { %v171_v4 = vpop.xlane.xlu1 %170 }
 0x272   :  { %291 = vrcp.f32 %v171_v4 }
 0x27c   :  { %v292_v6 = vpop.eup %291 }
 0x27d   :  { %v173_v8 = vmul.f32 %v292_v6, %v290_v0 }
 0x2c1   :  { %v188_v5 = vpop.xlane.xlu0 %187 }
 0x2c2   :  { %293 = vrcp.f32 %v188_v5 }
 0x2cc   :  { %v294_v7 = vpop.eup %293 }
 0x2cd   :  { %v190_v9 = vmul.f32 %v294_v7, %v288_v60 }
 0x2cf   :  { %v192_v10 = vsel %vm191_vm3, %v173_v8, %v190_v9 }
 0x2d0   :  { %v194_v11 = vsel %vm193_vm4, %v192_v10, 0.0 }
 0x2d1   :  { %195 = vst [vmem:[#allocation7] sm:$0x3] %v194_v11 }
 0x2d2   :  { %350 = shalt.err (!%p347_p6)
}
 0x2d3   :  { %s351_s16 = scalar_lea.hbm %s442_s3, 32 }
 0x2d4   :  { %p352_p7 = scmp.ne.s32.totalorder %s442_s3, %s351_s16  ;;  %p355_p8 = scmp.lt.u32.totalorder %s351_s16, %s442_s3 }
 0x2d6   :  { %p357_p9 = pnand %p355_p8, %p352_p7 }
 0x2d8   :  { %360 = shalt.err (!%p357_p9)
}
 0x2d9   :  { %205 = dma.vmem_to_hbm [thread:$0]  %s203_s12, 32, %s442_s3, [#allocation4]  }
 0x2da   :  { %365 = dma.done.wait [#allocation4], 32  }
 0x2db   :  { %366 = vsyncadd [#allocation4], 4294967264 }
 0x2dc   :  { %209 = vsyncpa [#allocation3], 1 }
 0x2dd   :  { %210 = vsyncpa [#allocation6], 1 }
 0x2de   :  { %211 = vsyncpa [#allocation4], 1 }

</bundles_post_ra>
